<compile_context>
chip_gen: v7x
topology: tpu7x:2x2x1
jax: 0.10.0
libtpu: 0.0.40
codegen_flags: <defaults>
</compile_context>

<pallas_src>
import jax
import jax.numpy as jnp
from jax.experimental import pallas as pl
from jax.experimental.pallas import tpu as pltpu

FEATURE_NUM = 108
HIDDEN = 100
PAD = 128          # lane-aligned width for feature / hidden dims


def _round_up(n, m):
    return ((n + m - 1) // m) * m


def _pad_to(a, shape):
    pads = [(0, s - d) for d, s in zip(a.shape, shape)]
    return jnp.pad(a, pads)


# ----------------------------------------------------------------------------
# Kernel
# ----------------------------------------------------------------------------
def baseline_kernel(x_ref,
                    wf_ref, bf_ref,          # fused first layers (128, 384)
                    w3b_ref, b3b_ref,        # mlp3 layer-1 (128, 128)
                    w4b_ref, b4b_ref,        # mlp4 layer-1 (128, 128)
                    w4c_ref, b4c_ref,        # mlp4 layer-2 (128, 128)
                    wh_ref, bh_ref,          # packed heads (512, 1), (1, 1)
                    out_ref):
    x = x_ref[...]                                          # (TB, 128)

    def relu(v):
        return jnp.maximum(v, 0.0)

    # Fused first layers of mlp2 / mlp3 / mlp4: one (TB,128)@(128,384) matmul.
    h_first = relu(
        jnp.dot(x, wf_ref[...], preferred_element_type=jnp.float32)
        + bf_ref[...])                                      # (TB, 384)
    h2 = h_first[:, 0 * PAD:1 * PAD]                        # lane-aligned views
    h3 = h_first[:, 1 * PAD:2 * PAD]
    h4 = h_first[:, 2 * PAD:3 * PAD]

    # mlp3 hidden layer.
    h3 = relu(jnp.dot(h3, w3b_ref[...], preferred_element_type=jnp.float32)
              + b3b_ref[...])
    # mlp4 two hidden layers.
    h4 = relu(jnp.dot(h4, w4b_ref[...], preferred_element_type=jnp.float32)
              + b4b_ref[...])
    h4 = relu(jnp.dot(h4, w4c_ref[...], preferred_element_type=jnp.float32)
              + b4c_ref[...])

    # Heads + final sum: static sublane slices of the packed (512,1) weight,
    # so no activation concat buffer is materialized in VMEM.
    o = (jnp.dot(x,  wh_ref[0 * PAD:1 * PAD, :], preferred_element_type=jnp.float32)
         + jnp.dot(h2, wh_ref[1 * PAD:2 * PAD, :], preferred_element_type=jnp.float32)
         + jnp.dot(h3, wh_ref[2 * PAD:3 * PAD, :], preferred_element_type=jnp.float32)
         + jnp.dot(h4, wh_ref[3 * PAD:4 * PAD, :], preferred_element_type=jnp.float32)
         + bh_ref[...])                                     # (TB, 1)

    out_ref[...] = jax.nn.sigmoid(o)


# ----------------------------------------------------------------------------
# Weight packing (zero-padded, lane-aligned, fused)
# ----------------------------------------------------------------------------
def pack_params(params):
    (w1, b1,
     w2a, b2a, w2b, b2b,
     w3a, b3a, w3b, b3b, w3c, b3c,
     w4a, b4a, w4b, b4b, w4c, b4c, w4d, b4d) = params

    # Fused first layers: (128, 3*128) and (1, 3*128). Padded rows/cols are
    # zero, so they contribute 0 through the dot and stay 0 through ReLU.
    wf = jnp.concatenate([_pad_to(w2a, (PAD, PAD)),
                          _pad_to(w3a, (PAD, PAD)),
                          _pad_to(w4a, (PAD, PAD))], axis=1)
    bf = jnp.concatenate([_pad_to(b2a, (1, PAD)),
                          _pad_to(b3a, (1, PAD)),
                          _pad_to(b4a, (1, PAD))], axis=1)

    w3b_p, b3b_p = _pad_to(w3b, (PAD, PAD)), _pad_to(b3b, (1, PAD))
    w4b_p, b4b_p = _pad_to(w4b, (PAD, PAD)), _pad_to(b4b, (1, PAD))
    w4c_p, b4c_p = _pad_to(w4c, (PAD, PAD)), _pad_to(b4c, (1, PAD))

    # Packed heads: stacked along K (zero rows kill padded lanes); biases sum.
    wh = jnp.concatenate([_pad_to(w1, (PAD, 1)),
                          _pad_to(w2b, (PAD, 1)),
                          _pad_to(w3c, (PAD, 1)),
                          _pad_to(w4d, (PAD, 1))], axis=0)  # (512, 1)
    bh = b1 + b2b + b3c + b4d                               # (1, 1)

    return (wf, bf, w3b_p, b3b_p, w4b_p, b4b_p, w4c_p, b4c_p, wh, bh)


# ----------------------------------------------------------------------------
# Wrapper
# ----------------------------------------------------------------------------
def baseline_forward(x, params, *, max_tb=512):
    """x: (B, FEATURE_NUM) f32; params: flat list of (W, b) as in init_params."""
    B = x.shape[0]
    packed = pack_params(params)

    # Batch tile: big for throughput, but never larger than (rounded-up) B.
    TB = max_tb if B >= max_tb else _round_up(B, 8)
    B_pad = _round_up(B, TB)

    # Pad batch to a tile multiple and features to 128 lanes (zeros).
    xp = jnp.pad(x, ((0, B_pad - B), (0, PAD - FEATURE_NUM)))

    x_spec = pl.BlockSpec((TB, PAD), lambda i: (i, 0))
    out_spec = pl.BlockSpec((TB, 1), lambda i: (i, 0))
    # Weights: full-array blocks, constant index_map -> loaded once, resident.
    w_specs = [pl.BlockSpec(p.shape, lambda i: (0, 0)) for p in packed]

    out = pl.pallas_call(
        baseline_kernel,
        out_shape=jax.ShapeDtypeStruct((B_pad, 1), jnp.float32),
        grid=(B_pad // TB,),
        in_specs=[x_spec] + w_specs,
        out_specs=out_spec,
        compiler_params=pltpu.CompilerParams(
            dimension_semantics=("parallel",)),
    )(xp, *packed)
    return out[:B]


# ----------------------------------------------------------------------------
# Synthetic params + pure-JAX reference (unpadded, for correctness checking)
# ----------------------------------------------------------------------------
def init_params(key):
    """Deterministic synthetic init (PyTorch-Linear-like uniform scaling).
    Weights stored as (in_features, out_features); biases as (1, out)."""
    shapes = [
        (FEATURE_NUM, 1),                                          # mlp1
        (FEATURE_NUM, HIDDEN), (HIDDEN, 1),                        # mlp2
        (FEATURE_NUM, HIDDEN), (HIDDEN, HIDDEN), (HIDDEN, 1),      # mlp3
        (FEATURE_NUM, HIDDEN), (HIDDEN, HIDDEN), (HIDDEN, HIDDEN), (HIDDEN, 1),  # mlp4
    ]
    params = []
    keys = jax.random.split(key, 2 * len(shapes))
    for i, (fan_in, fan_out) in enumerate(shapes):
        bound = 1.0 / jnp.sqrt(jnp.float32(fan_in))
        w = jax.random.uniform(keys[2 * i], (fan_in, fan_out),
                               minval=-bound, maxval=bound, dtype=jnp.float32)
        b = jax.random.uniform(keys[2 * i + 1], (1, fan_out),
                               minval=-bound, maxval=bound, dtype=jnp.float32)
        params.extend([w, b])
    return params


def reference_forward(x, params):
    (w1, b1,
     w2a, b2a, w2b, b2b,
     w3a, b3a, w3b, b3b, w3c, b3c,
     w4a, b4a, w4b, b4b, w4c, b4c, w4d, b4d) = params
    relu = lambda v: jnp.maximum(v, 0.0)
    o1 = x @ w1 + b1
    o2 = relu(x @ w2a + b2a) @ w2b + b2b
    h3 = relu(relu(x @ w3a + b3a) @ w3b + b3b)
    o3 = h3 @ w3c + b3c
    h4 = relu(relu(relu(x @ w4a + b4a) @ w4b + b4b) @ w4c + b4c)
    o4 = h4 @ w4d + b4d
    return jax.nn.sigmoid(o1 + o2 + o3 + o4)


if __name__ == "__main__":
    key = jax.random.PRNGKey(0)
    k_x, k_p = jax.random.split(key)

    batch_size = 16  # matches the original module's demo batch
    x = jax.random.normal(k_x, (batch_size, FEATURE_NUM), dtype=jnp.float32)
    params = init_params(k_p)

    out = jax.block_until_ready(baseline_forward(x, params))
    ref = reference_forward(x, params)

    assert out.shape == (batch_size, 1)
    assert jnp.allclose(out, ref, atol=1e-5, rtol=1e-5)

    print("KERNEL_OK")
</pallas_src>

<mosaic_0001>
module attributes {stable_mosaic.version = 11 : i64} {
  func.func @baseline_kernel(%arg0: i32, %arg1: memref<16x128xf32, #tpu.memory_space<vmem>>, %arg2: memref<128x384xf32, #tpu.memory_space<vmem>>, %arg3: memref<1x384xf32, #tpu.memory_space<vmem>>, %arg4: memref<128x128xf32, #tpu.memory_space<vmem>>, %arg5: memref<1x128xf32, #tpu.memory_space<vmem>>, %arg6: memref<128x128xf32, #tpu.memory_space<vmem>>, %arg7: memref<1x128xf32, #tpu.memory_space<vmem>>, %arg8: memref<128x128xf32, #tpu.memory_space<vmem>>, %arg9: memref<1x128xf32, #tpu.memory_space<vmem>>, %arg10: memref<512x1xf32, #tpu.memory_space<vmem>>, %arg11: memref<1x1xf32, #tpu.memory_space<vmem>>, %arg12: memref<16x1xf32, #tpu.memory_space<vmem>>) attributes {dimension_semantics = [#tpu.dimension_semantics<parallel>], iteration_bounds = array<i64: 1>, scalar_prefetch = 0 : i64, scratch_operands = 0 : i64, tpu.core_type = #tpu.core_type<tc>, window_params = [{transform_indices = @transform_0, window_bounds = array<i64: 16, 128>}, {pipeline_mode = #tpu.pipeline_mode<synchronous>, transform_indices = @transform_1, window_bounds = array<i64: 128, 384>}, {pipeline_mode = #tpu.pipeline_mode<synchronous>, transform_indices = @transform_2, window_bounds = array<i64: 1, 384>}, {pipeline_mode = #tpu.pipeline_mode<synchronous>, transform_indices = @transform_3, window_bounds = array<i64: 128, 128>}, {pipeline_mode = #tpu.pipeline_mode<synchronous>, transform_indices = @transform_4, window_bounds = array<i64: 1, 128>}, {pipeline_mode = #tpu.pipeline_mode<synchronous>, transform_indices = @transform_5, window_bounds = array<i64: 128, 128>}, {pipeline_mode = #tpu.pipeline_mode<synchronous>, transform_indices = @transform_6, window_bounds = array<i64: 1, 128>}, {pipeline_mode = #tpu.pipeline_mode<synchronous>, transform_indices = @transform_7, window_bounds = array<i64: 128, 128>}, {pipeline_mode = #tpu.pipeline_mode<synchronous>, transform_indices = @transform_8, window_bounds = array<i64: 1, 128>}, {pipeline_mode = #tpu.pipeline_mode<synchronous>, transform_indices = @transform_9, window_bounds = array<i64: 512, 1>}, {pipeline_mode = #tpu.pipeline_mode<synchronous>, transform_indices = @transform_10, window_bounds = array<i64: 1, 1>}, {transform_indices = @transform_11, window_bounds = array<i64: 16, 1>}]} {
    %c0 = arith.constant 0 : index
    %c0_0 = arith.constant 0 : index
    %0 = vector.load %arg1[%c0, %c0_0] : memref<16x128xf32, #tpu.memory_space<vmem>>, vector<16x128xf32>
    %c0_1 = arith.constant 0 : index
    %c0_2 = arith.constant 0 : index
    %1 = vector.load %arg2[%c0_1, %c0_2] : memref<128x384xf32, #tpu.memory_space<vmem>>, vector<128x384xf32>
    %cst = arith.constant dense<0.000000e+00> : vector<16x384xf32>
    %2 = tpu.matmul %0, %1, %cst {dimension_numbers = #tpu.dot_dimension_numbers<[1], [0], [0], [1], [0, 0, 1, 1], [], []>} : vector<16x128xf32>, vector<128x384xf32>, vector<16x384xf32> -> vector<16x384xf32>
    %c0_3 = arith.constant 0 : index
    %c0_4 = arith.constant 0 : index
    %3 = vector.load %arg3[%c0_3, %c0_4] : memref<1x384xf32, #tpu.memory_space<vmem>>, vector<1x384xf32>
    %4 = vector.broadcast %3 : vector<1x384xf32> to vector<16x384xf32>
    %5 = arith.addf %2, %4 : vector<16x384xf32>
    %cst_5 = arith.constant 0.000000e+00 : f32
    %6 = vector.broadcast %cst_5 : f32 to vector<16x384xf32>
    %7 = arith.maximumf %5, %6 : vector<16x384xf32>
    %8 = vector.extract_strided_slice %7 {offsets = [0, 0], sizes = [16, 128], strides = [1, 1]} : vector<16x384xf32> to vector<16x128xf32>
    %9 = vector.extract_strided_slice %7 {offsets = [0, 128], sizes = [16, 128], strides = [1, 1]} : vector<16x384xf32> to vector<16x128xf32>
    %10 = vector.extract_strided_slice %7 {offsets = [0, 256], sizes = [16, 128], strides = [1, 1]} : vector<16x384xf32> to vector<16x128xf32>
    %c0_6 = arith.constant 0 : index
    %c0_7 = arith.constant 0 : index
    %11 = vector.load %arg4[%c0_6, %c0_7] : memref<128x128xf32, #tpu.memory_space<vmem>>, vector<128x128xf32>
    %cst_8 = arith.constant dense<0.000000e+00> : vector<16x128xf32>
    %12 = tpu.matmul %9, %11, %cst_8 {dimension_numbers = #tpu.dot_dimension_numbers<[1], [0], [0], [1], [0, 0, 1, 1], [], []>} : vector<16x128xf32>, vector<128x128xf32>, vector<16x128xf32> -> vector<16x128xf32>
    %c0_9 = arith.constant 0 : index
    %c0_10 = arith.constant 0 : index
    %13 = vector.load %arg5[%c0_9, %c0_10] : memref<1x128xf32, #tpu.memory_space<vmem>>, vector<1x128xf32>
    %14 = vector.broadcast %13 : vector<1x128xf32> to vector<16x128xf32>
    %15 = arith.addf %12, %14 : vector<16x128xf32>
    %cst_11 = arith.constant 0.000000e+00 : f32
    %16 = vector.broadcast %cst_11 : f32 to vector<16x128xf32>
    %17 = arith.maximumf %15, %16 : vector<16x128xf32>
    %c0_12 = arith.constant 0 : index
    %c0_13 = arith.constant 0 : index
    %18 = vector.load %arg6[%c0_12, %c0_13] : memref<128x128xf32, #tpu.memory_space<vmem>>, vector<128x128xf32>
    %cst_14 = arith.constant dense<0.000000e+00> : vector<16x128xf32>
    %19 = tpu.matmul %10, %18, %cst_14 {dimension_numbers = #tpu.dot_dimension_numbers<[1], [0], [0], [1], [0, 0, 1, 1], [], []>} : vector<16x128xf32>, vector<128x128xf32>, vector<16x128xf32> -> vector<16x128xf32>
    %c0_15 = arith.constant 0 : index
    %c0_16 = arith.constant 0 : index
    %20 = vector.load %arg7[%c0_15, %c0_16] : memref<1x128xf32, #tpu.memory_space<vmem>>, vector<1x128xf32>
    %21 = vector.broadcast %20 : vector<1x128xf32> to vector<16x128xf32>
    %22 = arith.addf %19, %21 : vector<16x128xf32>
    %cst_17 = arith.constant 0.000000e+00 : f32
    %23 = vector.broadcast %cst_17 : f32 to vector<16x128xf32>
    %24 = arith.maximumf %22, %23 : vector<16x128xf32>
    %c0_18 = arith.constant 0 : index
    %c0_19 = arith.constant 0 : index
    %25 = vector.load %arg8[%c0_18, %c0_19] : memref<128x128xf32, #tpu.memory_space<vmem>>, vector<128x128xf32>
    %cst_20 = arith.constant dense<0.000000e+00> : vector<16x128xf32>
    %26 = tpu.matmul %24, %25, %cst_20 {dimension_numbers = #tpu.dot_dimension_numbers<[1], [0], [0], [1], [0, 0, 1, 1], [], []>} : vector<16x128xf32>, vector<128x128xf32>, vector<16x128xf32> -> vector<16x128xf32>
    %c0_21 = arith.constant 0 : index
    %c0_22 = arith.constant 0 : index
    %27 = vector.load %arg9[%c0_21, %c0_22] : memref<1x128xf32, #tpu.memory_space<vmem>>, vector<1x128xf32>
    %28 = vector.broadcast %27 : vector<1x128xf32> to vector<16x128xf32>
    %29 = arith.addf %26, %28 : vector<16x128xf32>
    %cst_23 = arith.constant 0.000000e+00 : f32
    %30 = vector.broadcast %cst_23 : f32 to vector<16x128xf32>
    %31 = arith.maximumf %29, %30 : vector<16x128xf32>
    %c0_24 = arith.constant 0 : index
    %c0_25 = arith.constant 0 : index
    %32 = vector.load %arg10[%c0_24, %c0_25] : memref<512x1xf32, #tpu.memory_space<vmem>>, vector<128x1xf32>
    %cst_26 = arith.constant dense<0.000000e+00> : vector<16x1xf32>
    %33 = tpu.matmul %0, %32, %cst_26 {dimension_numbers = #tpu.dot_dimension_numbers<[1], [0], [0], [1], [0, 0, 1, 1], [], []>} : vector<16x128xf32>, vector<128x1xf32>, vector<16x1xf32> -> vector<16x1xf32>
    %c128 = arith.constant 128 : index
    %c0_27 = arith.constant 0 : index
    %34 = vector.load %arg10[%c128, %c0_27] : memref<512x1xf32, #tpu.memory_space<vmem>>, vector<128x1xf32>
    %cst_28 = arith.constant dense<0.000000e+00> : vector<16x1xf32>
    %35 = tpu.matmul %8, %34, %cst_28 {dimension_numbers = #tpu.dot_dimension_numbers<[1], [0], [0], [1], [0, 0, 1, 1], [], []>} : vector<16x128xf32>, vector<128x1xf32>, vector<16x1xf32> -> vector<16x1xf32>
    %36 = arith.addf %33, %35 : vector<16x1xf32>
    %c256 = arith.constant 256 : index
    %c0_29 = arith.constant 0 : index
    %37 = vector.load %arg10[%c256, %c0_29] : memref<512x1xf32, #tpu.memory_space<vmem>>, vector<128x1xf32>
    %cst_30 = arith.constant dense<0.000000e+00> : vector<16x1xf32>
    %38 = tpu.matmul %17, %37, %cst_30 {dimension_numbers = #tpu.dot_dimension_numbers<[1], [0], [0], [1], [0, 0, 1, 1], [], []>} : vector<16x128xf32>, vector<128x1xf32>, vector<16x1xf32> -> vector<16x1xf32>
    %39 = arith.addf %36, %38 : vector<16x1xf32>
    %c384 = arith.constant 384 : index
    %c0_31 = arith.constant 0 : index
    %40 = vector.load %arg10[%c384, %c0_31] : memref<512x1xf32, #tpu.memory_space<vmem>>, vector<128x1xf32>
    %cst_32 = arith.constant dense<0.000000e+00> : vector<16x1xf32>
    %41 = tpu.matmul %31, %40, %cst_32 {dimension_numbers = #tpu.dot_dimension_numbers<[1], [0], [0], [1], [0, 0, 1, 1], [], []>} : vector<16x128xf32>, vector<128x1xf32>, vector<16x1xf32> -> vector<16x1xf32>
    %42 = arith.addf %39, %41 : vector<16x1xf32>
    %c0_33 = arith.constant 0 : index
    %c0_34 = arith.constant 0 : index
    %43 = vector.load %arg11[%c0_33, %c0_34] : memref<1x1xf32, #tpu.memory_space<vmem>>, vector<1x1xf32>
    %44 = vector.broadcast %43 : vector<1x1xf32> to vector<16x1xf32>
    %45 = arith.addf %42, %44 : vector<16x1xf32>
    %46 = arith.negf %45 : vector<16x1xf32>
    %47 = math.exp %46 : vector<16x1xf32>
    %cst_35 = arith.constant 1.000000e+00 : f32
    %48 = vector.broadcast %cst_35 : f32 to vector<16x1xf32>
    %49 = arith.addf %48, %47 : vector<16x1xf32>
    %50 = arith.divf %48, %49 : vector<16x1xf32>
    %c0_36 = arith.constant 0 : index
    %c0_37 = arith.constant 0 : index
    %51 = vector.load %arg12[%c0_36, %c0_37] : memref<16x1xf32, #tpu.memory_space<vmem>>, vector<16x1xf32>
    tpu.vector_store %arg12[%c0_36, %c0_37], %50 {strides = array<i32>} : memref<16x1xf32, #tpu.memory_space<vmem>>, vector<16x1xf32>,
    return
  }
  func.func @transform_0(%arg0: i32) -> (i32, i32) {
    %c0_i32 = arith.constant 0 : i32
    %c0_i32_0 = arith.constant 0 : i32
    return %arg0, %c0_i32 : i32, i32
  }
  func.func @transform_1(%arg0: i32) -> (i32, i32) {
    %c0_i32 = arith.constant 0 : i32
    %c0_i32_0 = arith.constant 0 : i32
    %c0_i32_1 = arith.constant 0 : i32
    return %c0_i32, %c0_i32_0 : i32, i32
  }
  func.func @transform_2(%arg0: i32) -> (i32, i32) {
    %c0_i32 = arith.constant 0 : i32
    %c0_i32_0 = arith.constant 0 : i32
    %c0_i32_1 = arith.constant 0 : i32
    return %c0_i32, %c0_i32_0 : i32, i32
  }
  func.func @transform_3(%arg0: i32) -> (i32, i32) {
    %c0_i32 = arith.constant 0 : i32
    %c0_i32_0 = arith.constant 0 : i32
    %c0_i32_1 = arith.constant 0 : i32
    return %c0_i32, %c0_i32_0 : i32, i32
  }
  func.func @transform_4(%arg0: i32) -> (i32, i32) {
    %c0_i32 = arith.constant 0 : i32
    %c0_i32_0 = arith.constant 0 : i32
    %c0_i32_1 = arith.constant 0 : i32
    return %c0_i32, %c0_i32_0 : i32, i32
  }
  func.func @transform_5(%arg0: i32) -> (i32, i32) {
    %c0_i32 = arith.constant 0 : i32
    %c0_i32_0 = arith.constant 0 : i32
    %c0_i32_1 = arith.constant 0 : i32
    return %c0_i32, %c0_i32_0 : i32, i32
  }
  func.func @transform_6(%arg0: i32) -> (i32, i32) {
    %c0_i32 = arith.constant 0 : i32
    %c0_i32_0 = arith.constant 0 : i32
    %c0_i32_1 = arith.constant 0 : i32
    return %c0_i32, %c0_i32_0 : i32, i32
  }
  func.func @transform_7(%arg0: i32) -> (i32, i32) {
    %c0_i32 = arith.constant 0 : i32
    %c0_i32_0 = arith.constant 0 : i32
    %c0_i32_1 = arith.constant 0 : i32
    return %c0_i32, %c0_i32_0 : i32, i32
  }
  func.func @transform_8(%arg0: i32) -> (i32, i32) {
    %c0_i32 = arith.constant 0 : i32
    %c0_i32_0 = arith.constant 0 : i32
    %c0_i32_1 = arith.constant 0 : i32
    return %c0_i32, %c0_i32_0 : i32, i32
  }
  func.func @transform_9(%arg0: i32) -> (i32, i32) {
    %c0_i32 = arith.constant 0 : i32
    %c0_i32_0 = arith.constant 0 : i32
    %c0_i32_1 = arith.constant 0 : i32
    return %c0_i32, %c0_i32_0 : i32, i32
  }
  func.func @transform_10(%arg0: i32) -> (i32, i32) {
    %c0_i32 = arith.constant 0 : i32
    %c0_i32_0 = arith.constant 0 : i32
    %c0_i32_1 = arith.constant 0 : i32
    return %c0_i32, %c0_i32_0 : i32, i32
  }
  func.func @transform_11(%arg0: i32) -> (i32, i32) {
    %c0_i32 = arith.constant 0 : i32
    %c0_i32_0 = arith.constant 0 : i32
    return %arg0, %c0_i32 : i32, i32
  }
}

</mosaic_0001>

<bundles_post_ra>
// kernel: tpu_custom_call.1
= control target key start
LH: loop header
LB: loop body
LE: loop exit
PB: predicated region body
PF: predicated region fallthrough
CT: control target
= control target key end

     0   :  { %s2350_s0 = inlined_call_operand.hbm [shape: f32[16,128], index: 0, kind: input, shape index: {}]   ;;  %s2351_s1 = inlined_call_operand.vmem [shape: f32[128,384], index: 1, kind: input, shape index: {}]   ;;  %s2352_s2 = inlined_call_operand.vmem [shape: f32[1,384], index: 2, kind: input, shape index: {}]   ;;  %s2353_s3 = inlined_call_operand.vmem [shape: f32[128,128], index: 3, kind: input, shape index: {}]   ;;  %s2354_s4 = inlined_call_operand.vmem [shape: f32[1,128], index: 4, kind: input, shape index: {}]   ;;  %s2355_s5 = inlined_call_operand.hbm [shape: f32[128,128], index: 5, kind: input, shape index: {}]   ;;  %s2356_s6 = inlined_call_operand.vmem [shape: f32[1,128], index: 6, kind: input, shape index: {}]   ;;  %s2357_s7 = inlined_call_operand.hbm [shape: f32[128,128], index: 7, kind: input, shape index: {}]   ;;  %s2358_s8 = inlined_call_operand.vmem [shape: f32[1,128], index: 8, kind: input, shape index: {}]   ;;  %s2359_s9 = inlined_call_operand.vmem [shape: f32[512,1], index: 9, kind: input, shape index: {}]   ;;  %s2360_s10 = inlined_call_operand.<no memory space> [shape: f32[1,1], index: 10, kind: input, shape index: {}]   ;;  %s2361_s11 = inlined_call_operand.vmem [shape: f32[16,1], index: 11, kind: output, shape index: {}]  }
   0x1   :  { %v16_v0 = vstv %s2360_s10 }
   0x2   :  { %17 = vst [vmem:[#allocation2] sm:$0x1] %v16_v0 }
   0x3   :  { %18 = vsyncpa [#allocation4], 0 }
   0x4   :  { %19 = vsyncpa [#allocation6], 0  ;;  %s1812_s19 = smov [#allocation5]   ;;  %s1813_s21 = smov [#allocation3]  }
   0x5   :  { %s45_s20 = sshll.u32 %s1812_s19, 4  ;;  %s25_s22 = sshll.u32 %s1813_s21, 4  ;;  %s46_s20 = int_to_ptr.vmem [resolvable:$true] %s45_s20  ;;  %s1881_s22 = int_to_ptr.vmem [resolvable:$true] %s25_s22 }
   0x6   :  { %s1742_s25 = scalar_lea.hbm %s2355_s5, 2048 }
   0x7   :  { %p1743_p0 = scmp.ne.s32.totalorder %s2355_s5, %s1742_s25  ;;  %p1746_p1 = scmp.lt.u32.totalorder %s1742_s25, %s2355_s5 }
   0x9   :  { %p1748_p2 = pnand %p1746_p1, %p1743_p0 }
   0xb   :  { %1751 = shalt.err (!%p1748_p2)
}
   0xc   :  { %s1752_s29 = scalar_lea.vmem %s46_s20, 2048  ;;  %p1757_p4 = scmp.lt.s32.totalorder %s46_s20, %s46_s20 }
   0xd   :  { %p1753_p3 = scmp.ne.s32.totalorder %s46_s20, %s1752_s29  ;;  %p1758_p5 = scmp.lt.s32.totalorder %s1752_s29, %s1752_s29 }
   0xf   :  { %p1759_p6 = por %p1758_p5, %p1757_p4 }
  0x11   :  { %p1760_p7 = pnand %p1759_p6, %p1753_p3 }
  0x13   :  { %1763 = shalt.err (!%p1760_p7)
}
  0x14   :  { %s1814_s30 = smov 128   ;;  %s1815_s12 = smov 8  }
  0x15   :  { %51 = dma.hbm_to_vmem [thread:$0]  %s2355_s5, 2048, %s46_s20, [#allocation6], %s1814_s30, %s1814_s30, %s1815_s12  }
  0x16   :  { %s1764_s17 = scalar_lea.hbm %s2350_s0, 256 }
  0x17   :  { %p1765_p8 = scmp.ne.s32.totalorder %s2350_s0, %s1764_s17  ;;  %p1768_p9 = scmp.lt.u32.totalorder %s1764_s17, %s2350_s0 }
  0x19   :  { %p1770_p10 = pnand %p1768_p9, %p1765_p8 }
  0x1b   :  { %1773 = shalt.err (!%p1770_p10)
}
  0x1c   :  { %s1774_s24 = scalar_lea.vmem %s1881_s22, 256  ;;  %p1779_p12 = scmp.lt.s32.totalorder %s1881_s22, %s1881_s22 }
  0x1d   :  { %p1775_p11 = scmp.ne.s32.totalorder %s1881_s22, %s1774_s24  ;;  %p1780_p13 = scmp.lt.s32.totalorder %s1774_s24, %s1774_s24 }
  0x1f   :  { %p1781_p0 = por %p1780_p13, %p1779_p12 }
  0x21   :  { %p1782_p1 = pnand %p1781_p0, %p1775_p11 }
  0x23   :  { %1785 = shalt.err (!%p1782_p1)
}
  0x24   :  { %31 = dma.hbm_to_vmem [thread:$0]  %s2350_s0, 256, %s1881_s22, [#allocation4], %s1814_s30, %s1814_s30, %s1815_s12  }
  0x25   :  { %s1816_s25 = smov [#allocation7]   ;;  %s1786_s10 = scalar_lea.hbm %s2357_s7, 2048 }
  0x26   :  { %s59_s26 = sshll.u32 %s1816_s25, 4  ;;  %p1787_p2 = scmp.ne.s32.totalorder %s2357_s7, %s1786_s10  ;;  %s60_s26 = int_to_ptr.vmem [resolvable:$true] %s59_s26 }
  0x27   :  { %p1790_p3 = scmp.lt.u32.totalorder %s1786_s10, %s2357_s7 }
  0x29   :  { %p1792_p4 = pnand %p1790_p3, %p1787_p2 }
  0x2b   :  { %1795 = shalt.err (!%p1792_p4)
}
  0x2c   :  { %s1796_s16 = scalar_lea.vmem %s60_s26, 2048  ;;  %p1801_p6 = scmp.lt.s32.totalorder %s60_s26, %s60_s26 }
  0x2d   :  { %p1797_p5 = scmp.ne.s32.totalorder %s60_s26, %s1796_s16  ;;  %p1802_p7 = scmp.lt.s32.totalorder %s1796_s16, %s1796_s16 }
  0x2f   :  { %p1803_p8 = por %p1802_p7, %p1801_p6 }
  0x31   :  { %p1804_p9 = pnand %p1803_p8, %p1797_p5 }
  0x33   :  { %1807 = shalt.err (!%p1804_p9)
}
  0x34   :  { %65 = dma.hbm_to_vmem [thread:$0]  %s2357_s7, 2048, %s60_s26, [#allocation6], %s1814_s30, %s1814_s30, %s1815_s12  }
  0x35   :  { %1808 = dma.done.wait [#allocation4], 256  }
  0x36   :  { %1809 = vsyncadd [#allocation4], 4294967040 }
  0x37   :  { %1810 = dma.done.wait [#allocation6], 4096  }
  0x38   :  { %1811 = vsyncadd [#allocation6], 4294963200  ;;  %v1817_v1 = vmov 0.0   ;;  %v84_v2 = vld [vmem:[%s2351_s1 + $0x8] sm:$0xff]  ;;  %v87_v3 = vld [vmem:[%s2351_s1 + $0x20] sm:$0xff]  ;;  %vm995_vm0 = vcmask 7168  }
  0x39   :  { %212 = vmatprep.mubr.f32.mxu0 %v1817_v1  ;;  %v83_v4 = vld [vmem:[%s2351_s1] sm:$0xff]  ;;  %v1434_v5 = vpack.c.bf16 %v87_v3, %v84_v2  ;;  %v86_v6 = vld [vmem:[%s2351_s1 + $0x18] sm:$0xff]  ;;  %v93_v8 = vld [vmem:[%s2351_s1 + $0x50] sm:$0xff] }
  0x3a   :  { %v90_v7 = vld [vmem:[%s2351_s1 + $0x38] sm:$0xff]  ;;  %v1436_v9 = vpack.c.bf16 %v86_v6, %v83_v4  ;;  %v89_v11 = vld [vmem:[%s2351_s1 + $0x30] sm:$0xff]  ;;  %v92_v12 = vld [vmem:[%s2351_s1 + $0x48] sm:$0xff] }
  0x3b   :  { %v1438_v10 = vpack.c.bf16 %v93_v8, %v90_v7  ;;  %v96_v13 = vld [vmem:[%s2351_s1 + $0x68] sm:$0xff]  ;;  %1435 = vmatprep.subr.bf16.mxu0 %v1434_v5  ;;  %v99_v14 = vld [vmem:[%s2351_s1 + $0x80] sm:$0xff]  ;;  %v1440_v15 = vpack.c.bf16 %v92_v12, %v89_v11  ;;  %v98_v18 = vld [vmem:[%s2351_s1 + $0x78] sm:$0xff] }
  0x3c   :  { %1437 = vmatpush1.bf16.msra.mxu0 %v1436_v9  ;;  %v1442_v16 = vpack.c.bf16 %v99_v14, %v96_v13  ;;  %v95_v17 = vld [vmem:[%s2351_s1 + $0x60] sm:$0xff]  ;;  %v102_v19 = vld [vmem:[%s2351_s1 + $0x98] sm:$0xff]  ;;  %v105_v20 = vld [vmem:[%s2351_s1 + $0xb0] sm:$0xff] }
  0x3d   :  { %1439 = vmatprep.subr.bf16.mxu0 %v1438_v10  ;;  %v1444_v21 = vpack.c.bf16 %v98_v18, %v95_v17  ;;  %v1446_v22 = vpack.c.bf16 %v105_v20, %v102_v19  ;;  %v101_v23 = vld [vmem:[%s2351_s1 + $0x90] sm:$0xff]  ;;  %v104_v24 = vld [vmem:[%s2351_s1 + $0xa8] sm:$0xff]  ;;  %v111_v26 = vld [vmem:[%s2351_s1 + $0xe0] sm:$0xff] }
  0x3e   :  { %v108_v25 = vld [vmem:[%s2351_s1 + $0xc8] sm:$0xff]  ;;  %v1448_v27 = vpack.c.bf16 %v104_v24, %v101_v23  ;;  %v107_v29 = vld [vmem:[%s2351_s1 + $0xc0] sm:$0xff]  ;;  %v110_v30 = vld [vmem:[%s2351_s1 + $0xd8] sm:$0xff] }
  0x3f   :  { %v1450_v28 = vpack.c.bf16 %v111_v26, %v108_v25  ;;  %v114_v31 = vld [vmem:[%s2351_s1 + $0xf8] sm:$0xff]  ;;  %v117_v32 = vld [vmem:[%s2351_s1 + $0x110] sm:$0xff]  ;;  %v1452_v33 = vpack.c.bf16 %v110_v30, %v107_v29  ;;  %v116_v36 = vld [vmem:[%s2351_s1 + $0x108] sm:$0xff] }
  0x40   :  { %1441 = vmatpush1.bf16.msra.mxu0 %v1440_v15  ;;  %v1454_v34 = vpack.c.bf16 %v117_v32, %v114_v31  ;;  %v113_v35 = vld [vmem:[%s2351_s1 + $0xf0] sm:$0xff]  ;;  %v120_v37 = vld [vmem:[%s2351_s1 + $0x128] sm:$0xff]  ;;  %v123_v38 = vld [vmem:[%s2351_s1 + $0x140] sm:$0xff] }
  0x41   :  { %1443 = vmatprep.subr.bf16.mxu0 %v1442_v16  ;;  %v1456_v39 = vpack.c.bf16 %v116_v36, %v113_v35  ;;  %v1458_v40 = vpack.c.bf16 %v123_v38, %v120_v37  ;;  %v119_v41 = vld [vmem:[%s2351_s1 + $0x120] sm:$0xff]  ;;  %v122_v42 = vld [vmem:[%s2351_s1 + $0x138] sm:$0xff]  ;;  %v129_v44 = vld [vmem:[%s2351_s1 + $0x170] sm:$0xff] }
  0x42   :  { %v126_v43 = vld [vmem:[%s2351_s1 + $0x158] sm:$0xff]  ;;  %v1460_v45 = vpack.c.bf16 %v122_v42, %v119_v41  ;;  %v125_v47 = vld [vmem:[%s2351_s1 + $0x150] sm:$0xff]  ;;  %v128_v48 = vld [vmem:[%s2351_s1 + $0x168] sm:$0xff] }
  0x43   :  { %v1462_v46 = vpack.c.bf16 %v129_v44, %v126_v43  ;;  %v85_v49 = vld [vmem:[%s2351_s1 + $0x10] sm:$0xff]  ;;  %v88_v50 = vld [vmem:[%s2351_s1 + $0x28] sm:$0xff]  ;;  %v1464_v51 = vpack.c.bf16 %v128_v48, %v125_v47  ;;  %v91_v53 = vld [vmem:[%s2351_s1 + $0x40] sm:$0xff] }
  0x44   :  { %1445 = vmatpush1.bf16.msra.mxu0 %v1444_v21  ;;  %v1466_v52 = vpack.c.bf16 %v88_v50, %v85_v49  ;;  %v94_v54 = vld [vmem:[%s2351_s1 + $0x58] sm:$0xff]  ;;  %v2042_v55 = vld [vmem:[#allocation3] sm:$0xff]  ;;  %v97_v57 = vld [vmem:[%s2351_s1 + $0x70] sm:$0xff] }
  0x45   :  { %1447 = vmatprep.subr.bf16.mxu0 %v1446_v22  ;;  %v1470_v56 = vpack.c.bf16 %v94_v54, %v91_v53  ;;  %v100_v58 = vld [vmem:[%s2351_s1 + $0x88] sm:$0xff]  ;;  %v103_v61 = vld [vmem:[%s2351_s1 + $0xa0] sm:$0xff]  ;;  %v106_v62 = vld [vmem:[%s2351_s1 + $0xb8] sm:$0xff] }
  0x46   :  { %v2052_v59 = vld [vmem:[#allocation3 + $0x8] sm:$0xff]  ;;  %v1474_v60 = vpack.c.bf16 %v100_v58, %v97_v57  ;;  %v1478_v63 = vpack.c.bf16 %v106_v62, %v103_v61  ;;  %v115_v3 = vld [vmem:[%s2351_s1 + $0x100] sm:$0xff]  ;;  %v118_v4 = vld [vmem:[%s2351_s1 + $0x118] sm:$0xff] }
  0x47   :  { %v109_v0 = vld [vmem:[%s2351_s1 + $0xd0] sm:$0xff]  ;;  %v1486_v5 = vpack.c.bf16 %v118_v4, %v115_v3  ;;  %v124_v7 = vld [vmem:[%s2351_s1 + $0x148] sm:$0xff]  ;;  %v127_v9 = vld [vmem:[%s2351_s1 + $0x160] sm:$0xff]  ;;  %v133_v4 = vlaneseq }
  0x48   :  { %1449 = vmatpush1.bf16.msra.mxu0 %v1448_v27  ;;  %v121_v6 = vld [vmem:[%s2351_s1 + $0x130] sm:$0xff]  ;;  %v130_v10 = vld [vmem:[%s2351_s1 + $0x178] sm:$0xff]  ;;  %v306_v12 = vld [vmem:[%s2353_s3] sm:$0xff] }
  0x49   :  { %1451 = vmatprep.subr.bf16.mxu0 %v1450_v28  ;;  %v1490_v8 = vpack.c.bf16 %v124_v7, %v121_v6  ;;  %v1494_v11 = vpack.c.bf16 %v130_v10, %v127_v9  ;;  %v307_v13 = vld [vmem:[%s2353_s3 + $0x8] sm:$0xff]  ;;  %v308_v15 = vld [vmem:[%s2353_s3 + $0x10] sm:$0xff]  ;;  %v309_v16 = vld [vmem:[%s2353_s3 + $0x18] sm:$0xff] }
  0x4a   :  { %v1498_v14 = vpack.c.bf16 %v307_v13, %v306_v12  ;;  %v1502_v17 = vpack.c.bf16 %v309_v16, %v308_v15  ;;  %v406_v18 = vld [vmem:[#allocation5] sm:$0xff]  ;;  %v407_v19 = vld [vmem:[#allocation5 + $0x8] sm:$0xff]  ;;  %v311_v22 = vld [vmem:[%s2353_s3 + $0x28] sm:$0xff] }
  0x4b   :  { %v1530_v20 = vpack.c.bf16 %v407_v19, %v406_v18  ;;  %v310_v21 = vld [vmem:[%s2353_s3 + $0x20] sm:$0xff]  ;;  %v409_v25 = vld [vmem:[#allocation5 + $0x18] sm:$0xff]  ;;  %v313_v28 = vld [vmem:[%s2353_s3 + $0x38] sm:$0xff] }
  0x4c   :  { %1453 = vmatpush1.bf16.msra.mxu0 %v1452_v33  ;;  %v1506_v23 = vpack.c.bf16 %v311_v22, %v310_v21  ;;  %v408_v24 = vld [vmem:[#allocation5 + $0x10] sm:$0xff]  ;;  %v312_v26 = vld [vmem:[%s2353_s3 + $0x30] sm:$0xff]  ;;  %v411_v30 = vld [vmem:[#allocation5 + $0x28] sm:$0xff] }
  0x4d   :  { %1455 = vmatprep.subr.bf16.mxu0 %v1454_v34  ;;  %1531 = vmatprep.subr.bf16.mxu1 %v1530_v20  ;;  %v1534_v27 = vpack.c.bf16 %v409_v25, %v408_v24  ;;  %v410_v29 = vld [vmem:[#allocation5 + $0x20] sm:$0xff]  ;;  %v1510_v31 = vpack.c.bf16 %v313_v28, %v312_v26  ;;  %v314_v33 = vld [vmem:[%s2353_s3 + $0x40] sm:$0xff]  ;;  %v315_v34 = vld [vmem:[%s2353_s3 + $0x48] sm:$0xff] }
  0x4e   :  { %1533 = vmatpush3.bf16.msra.mxu1 %v1530_v20  ;;  %v1538_v32 = vpack.c.bf16 %v411_v30, %v410_v29  ;;  %v1514_v35 = vpack.c.bf16 %v315_v34, %v314_v33  ;;  %v412_v36 = vld [vmem:[#allocation5 + $0x30] sm:$0xff]  ;;  %v413_v37 = vld [vmem:[#allocation5 + $0x38] sm:$0xff]  ;;  %v414_v42 = vld [vmem:[#allocation5 + $0x40] sm:$0xff] }
  0x4f   :  { %1535 = vmatprep.subr.bf16.mxu1 %v1534_v27  ;;  %v316_v38 = vld [vmem:[%s2353_s3 + $0x50] sm:$0xff]  ;;  %v415_v43 = vld [vmem:[#allocation5 + $0x48] sm:$0xff]  ;;  %v416_v48 = vld [vmem:[#allocation5 + $0x50] sm:$0xff] }
  0x50   :  { %1457 = vmatpush1.bf16.msra.mxu0 %v1456_v39  ;;  %v317_v39 = vld [vmem:[%s2353_s3 + $0x58] sm:$0xff]  ;;  %v318_v44 = vld [vmem:[%s2353_s3 + $0x60] sm:$0xff]  ;;  %v417_v49 = vld [vmem:[#allocation5 + $0x58] sm:$0xff] }
  0x51   :  { %1459 = vmatprep.subr.bf16.mxu0 %v1458_v40  ;;  %v1542_v40 = vpack.c.bf16 %v413_v37, %v412_v36  ;;  %v1518_v41 = vpack.c.bf16 %v317_v39, %v316_v38  ;;  %v320_v50 = vld [vmem:[%s2353_s3 + $0x70] sm:$0xff]  ;;  %v420_v58 = vld [vmem:[#allocation5 + $0x70] sm:$0xff]  ;;  %v511_v21 = vld [vmem:[#allocation7 + $0x28] sm:$0xff] }
  0x52   :  { %1537 = vmatpush3.bf16.msra.mxu1 %v1534_v27  ;;  %v418_v54 = vld [vmem:[#allocation5 + $0x60] sm:$0xff]  ;;  %v622_v62 = vld [vmem:[%s2359_s9 + $0x80] sm:$0xff]  ;;  %v509_v16 = vld [vmem:[#allocation7 + $0x18] sm:$0xff] }
  0x53   :  { %1539 = vmatprep.subr.bf16.mxu1 %v1538_v32  ;;  %v131_v7 = vld [vmem:[%s2352_s2] sm:$0x7]  ;;  %v510_v20 = vld [vmem:[#allocation7 + $0x20] sm:$0xff]  ;;  %v513_v24 = vld [vmem:[#allocation7 + $0x38] sm:$0xff] }
  0x54   :  { %1461 = vmatpush1.bf16.msra.mxu0 %v1460_v45  ;;  %v319_v45 = vld [vmem:[%s2353_s3 + $0x68] sm:$0xff]  ;;  %v1570_v22 = vpack.c.bf16 %v511_v21, %v510_v20  ;;  %v514_v26 = vld [vmem:[#allocation7 + $0x40] sm:$0xff]  ;;  %v515_v27 = vld [vmem:[#allocation7 + $0x48] sm:$0xff] }
  0x55   :  { %1463 = vmatprep.subr.bf16.mxu0 %v1462_v46  ;;  %v1546_v46 = vpack.c.bf16 %v415_v43, %v414_v42  ;;  %v1522_v47 = vpack.c.bf16 %v319_v45, %v318_v44  ;;  %v508_v15 = vld [vmem:[#allocation7 + $0x10] sm:$0xff]  ;;  %v1578_v28 = vpack.c.bf16 %v515_v27, %v514_v26  ;;  %v624_v38 = vld [vmem:[%s2359_s9 + $0x90] sm:$0xff]  ;;  %v625_v39 = vld [vmem:[%s2359_s9 + $0x98] sm:$0xff] }
  0x56   :  { %1541 = vmatpush3.bf16.msra.mxu1 %v1538_v32  ;;  %v1566_v19 = vpack.c.bf16 %v509_v16, %v508_v15  ;;  %v1598_v42 = vpack.c.bf16 %v625_v39, %v624_v38  ;;  %v626_v44 = vld [vmem:[%s2359_s9 + $0xa0] sm:$0xff]  ;;  %v627_v45 = vld [vmem:[%s2359_s9 + $0xa8] sm:$0xff]  ;;  %v616_v16 = vld [vmem:[%s2359_s9 + $0x50] sm:$0xff] }
  0x57   :  { %1543 = vmatprep.subr.bf16.mxu1 %v1542_v40  ;;  %v619_v20 = vld [vmem:[%s2359_s9 + $0x68] sm:$0xff] }
  0x58   :  { %1465 = vmatpush1.bf16.msra.mxu0 %v1464_v51  ;;  %v321_v51 = vld [vmem:[%s2353_s3 + $0x78] sm:$0xff]  ;;  %v789_v26 = vld [vmem:[%s2359_s9 + $0x108] sm:$0xff] }
  0x59   :  { %1467 = vmatprep.subr.bf16.mxu0 %v1466_v52  ;;  %v1526_v53 = vpack.c.bf16 %v321_v51, %v320_v50  ;;  %v630_v50 = vld [vmem:[%s2359_s9 + $0xc0] sm:$0xff]  ;;  %v631_v51 = vld [vmem:[%s2359_s9 + $0xc8] sm:$0xff] }
  0x5a   :  { %1545 = vmatpush3.bf16.msra.mxu1 %v1542_v40  ;;  %v793_v38 = vld [vmem:[%s2359_s9 + $0x128] sm:$0xff] }
  0x5b   :  { %213 = vmatmul.mubr.f32.vlgmr.msra.gmra.mrb[0].mxu0 %v2042_v55  ;;  %1547 = vmatprep.subr.bf16.mxu1 %v1546_v46 }
  0x5c   :  { %1469 = vmatpush3.bf16.msra.mxu0 %v1466_v52  ;;  %218 = vmatprep.mubr.f32.mxu0 %v1817_v1  ;;  %v112_v1 = vld [vmem:[%s2351_s1 + $0xe8] sm:$0xff]  ;;  %v1550_v52 = vpack.c.bf16 %v417_v49, %v416_v48  ;;  %v629_v48 = vld [vmem:[%s2359_s9 + $0xb8] sm:$0xff] }
  0x5d   :  { %1471 = vmatprep.subr.bf16.mxu0 %v1470_v56  ;;  %v1482_v2 = vpack.c.bf16 %v112_v1, %v109_v0  ;;  %v506_v1 = vld [vmem:[#allocation7] sm:$0xff] }
  0x5e   :  { %1549 = vmatpush3.bf16.msra.mxu1 %v1546_v46  ;;  %v1602_v46 = vpack.c.bf16 %v627_v45, %v626_v44  ;;  %v798_v45 = vld [vmem:[%s2359_s9 + $0x150] sm:$0xff] }
  0x5f   :  { %219 = vmatmul.mubr.f32.gmra.mrb[2].mxu0 %v2052_v59  ;;  %1551 = vmatprep.subr.bf16.mxu1 %v1550_v52 }
  0x60   :  { %1473 = vmatpush3.bf16.msra.mxu0 %v1470_v56  ;;  %1186 = vmatprep.mubr.f32.mxu0 %v2042_v55  ;;  %v419_v56 = vld [vmem:[#allocation5 + $0x68] sm:$0xff] }
  0x61   :  { %1475 = vmatprep.subr.bf16.mxu0 %v1474_v60  ;;  %v1554_v57 = vpack.c.bf16 %v419_v56, %v418_v54  ;;  %v633_v54 = vld [vmem:[%s2359_s9 + $0xd8] sm:$0xff] }
  0x62   :  { %1553 = vmatpush3.bf16.msra.mxu1 %v1550_v52  ;;  %v1610_v52 = vpack.c.bf16 %v631_v51, %v630_v50  ;;  %v802_v51 = vld [vmem:[%s2359_s9 + $0x170] sm:$0xff] }
  0x63   :  { %1555 = vmatprep.subr.bf16.mxu1 %v1554_v57 }
  0x64   :  { %1477 = vmatpush3.bf16.msra.mxu0 %v1474_v60  ;;  %v421_v60 = vld [vmem:[#allocation5 + $0x78] sm:$0xff] }
  0x65   :  { %1479 = vmatprep.subr.bf16.mxu0 %v1478_v63  ;;  %v1558_v61 = vpack.c.bf16 %v421_v60, %v420_v58  ;;  %v635_v58 = vld [vmem:[%s2359_s9 + $0xe8] sm:$0xff] }
  0x66   :  { %1557 = vmatpush3.bf16.msra.mxu1 %v1554_v57  ;;  %v634_v57 = vld [vmem:[%s2359_s9 + $0xe0] sm:$0xff] }
  0x67   :  { %1559 = vmatprep.subr.bf16.mxu1 %v1558_v61  ;;  %v1618_v60 = vpack.c.bf16 %v635_v58, %v634_v57  ;;  %v881_v58 = vld [vmem:[%s2359_s9 + $0x180] sm:$0xff] }
  0x68   :  { %1481 = vmatpush3.bf16.msra.mxu0 %v1478_v63  ;;  %v623_v63 = vld [vmem:[%s2359_s9 + $0x88] sm:$0xff] }
  0x69   :  { %1483 = vmatprep.subr.bf16.mxu0 %v1482_v2  ;;  %v1594_v0 = vpack.c.bf16 %v623_v63, %v622_v62  ;;  %v637_v62 = vld [vmem:[%s2359_s9 + $0xf8] sm:$0xff] }
  0x6a   :  { %1561 = vmatpush3.bf16.msra.mxu1 %v1558_v61  ;;  %v636_v61 = vld [vmem:[%s2359_s9 + $0xf0] sm:$0xff] }
  0x6b   :  { %1595 = vmatprep.subr.bf16.mxu1 %v1594_v0  ;;  %v1622_v63 = vpack.c.bf16 %v637_v62, %v636_v61  ;;  %v1004_v62 = vld [vmem:[%s2354_s4] ss:$0 sm:$0xff] }
  0x6c   :  { %1485 = vmatpush3.bf16.msra.mxu0 %v1482_v2  ;;  %v507_v2 = vld [vmem:[#allocation7 + $0x8] sm:$0xff] }
  0x6d   :  { %1487 = vmatprep.subr.bf16.mxu0 %v1486_v5  ;;  %v1562_v3 = vpack.c.bf16 %v507_v2, %v506_v1  ;;  %v607_v1 = vld [vmem:[%s2359_s9 + $0x8] sm:$0xff] }
  0x70   :  { %1489 = vmatpush3.bf16.msra.mxu0 %v1486_v5  ;;  %v134_v5 = vshrl.u32 %v133_v4, 7  ;;  %v608_v4 = vld [vmem:[%s2359_s9 + $0x10] sm:$0xff] }
  0x71   :  { %1491 = vmatprep.subr.bf16.mxu0 %v1490_v8 }
  0x72   :  { %v139_v6 = vsub.s32 1, %v134_v5  ;;  %v143_v29 = vsub.s32 2, %v134_v5  ;;  %v135_v30 = vsub.s32 0, %v134_v5  ;;  %v609_v5 = vld [vmem:[%s2359_s9 + $0x18] sm:$0xff] }
  0x74   :  { %1493 = vmatpush3.bf16.msra.mxu0 %v1490_v8  ;;  %v140_v8 = vrot.slane %v131_v7, %v139_v6  ;;  %v136_v32 = vrot.slane %v131_v7, %v135_v30  ;;  %v790_v30 = vld [vmem:[%s2359_s9 + $0x110] sm:$0xff] }
  0x75   :  { %1495 = vmatprep.subr.bf16.mxu0 %v1494_v11 }
  0x78   :  { %1497 = vmatpush3.bf16.msra.mxu0 %v1494_v11 }
  0x79   :  { %1499 = vmatprep.subr.bf16.mxu0 %v1498_v14 }
  0x7b   :  { %1187 = vmatmul.mubr.f32.vlgmr.msra.gmra.mrb[4].mxu0 %v2052_v59 }
  0x7c   :  { %1501 = vmatpush3.bf16.msra.mxu0 %v1498_v14 }
  0x7d   :  { %1503 = vmatprep.subr.bf16.mxu0 %v1502_v17 }
  0x80   :  { %1505 = vmatpush3.bf16.msra.mxu0 %v1502_v17 }
  0x81   :  { %1507 = vmatprep.subr.bf16.mxu0 %v1506_v23 }
  0x84   :  { %1509 = vmatpush3.bf16.msra.mxu0 %v1506_v23  ;;  %v512_v23 = vld [vmem:[#allocation7 + $0x30] sm:$0xff] }
  0x85   :  { %1511 = vmatprep.subr.bf16.mxu0 %v1510_v31  ;;  %v1574_v25 = vpack.c.bf16 %v513_v24, %v512_v23  ;;  %v621_v23 = vld [vmem:[%s2359_s9 + $0x78] sm:$0xff] }
  0x88   :  { %1513 = vmatpush3.bf16.msra.mxu0 %v1510_v31  ;;  %v144_v31 = vrot.slane %v131_v7, %v143_v29  ;;  %v1630_v7 = vpack.c.bf16 %v609_v5, %v608_v4  ;;  %v517_v29 = vld [vmem:[#allocation7 + $0x58] sm:$0xff]  ;;  %v884_v4 = vld [vmem:[%s2359_s9 + $0x198] sm:$0xff] }
  0x89   :  { %1515 = vmatprep.subr.bf16.mxu0 %v1514_v35 }
  0x8c   :  { %1517 = vmatpush3.bf16.msra.mxu0 %v1514_v35 }
  0x8d   :  { %1519 = vmatprep.subr.bf16.mxu0 %v1518_v41 }
  0x90   :  { %1521 = vmatpush3.bf16.msra.mxu0 %v1518_v41 }
  0x91   :  { %1523 = vmatprep.subr.bf16.mxu0 %v1522_v47 }
  0x94   :  { %1525 = vmatpush3.bf16.msra.mxu0 %v1522_v47  ;;  %v628_v47 = vld [vmem:[%s2359_s9 + $0xb0] sm:$0xff] }
  0x95   :  { %1527 = vmatprep.subr.bf16.mxu0 %v1526_v53  ;;  %v1606_v49 = vpack.c.bf16 %v629_v48, %v628_v47  ;;  %v800_v48 = vld [vmem:[%s2359_s9 + $0x160] sm:$0xff] }
  0x98   :  { %1529 = vmatpush3.bf16.msra.mxu0 %v1526_v53  ;;  %v632_v53 = vld [vmem:[%s2359_s9 + $0xd0] sm:$0xff] }
  0x99   :  { %1563 = vmatprep.subr.bf16.mxu0 %v1562_v3  ;;  %v1614_v56 = vpack.c.bf16 %v633_v54, %v632_v53  ;;  %v520_v53 = vld [vmem:[#allocation7 + $0x70] sm:$0xff]  ;;  %v521_v54 = vld [vmem:[#allocation7 + $0x78] sm:$0xff] }
 0x12e   :  { %v214_v9 = vpop.f32.mrb[0].mxu0 }
 0x12f   :  { %v216_v10 = vpop.f32.mrb[1].mxu0  ;;  %v215_v36 = vadd.f32 %v214_v9, %v136_v32  ;;  %v611_v9 = vld [vmem:[%s2359_s9 + $0x28] sm:$0xff] }
 0x130   :  { %v217_v11 = vadd.f32 %v216_v10, %v140_v8 }
 0x131   :  { %v300_v43 = vmax.f32 %v215_v36, 0.0 }
 0x132   :  { %v301_v12 = vmax.f32 %v217_v11, 0.0  ;;  %v2144_v13 = vpop.f32.mrb[2].mxu0  ;;  %v612_v11 = vld [vmem:[%s2359_s9 + $0x30] sm:$0xff] }
 0x133   :  { %v222_v14 = vpop.f32.mrb[3].mxu0  ;;  %v221_v2 = vadd.f32 %v2144_v13, %v136_v32 }
 0x134   :  { %1221 = vmatprep.mubr.f32.mxu0 %v301_v12  ;;  %v223_v17 = vadd.f32 %v222_v14, %v140_v8  ;;  %v610_v8 = vld [vmem:[%s2359_s9 + $0x20] sm:$0xff]  ;;  %v613_v12 = vld [vmem:[%s2359_s9 + $0x38] sm:$0xff] }
 0x135   :  { %v303_v6 = vmax.f32 %v221_v2, 0.0  ;;  %v1634_v10 = vpack.c.bf16 %v611_v9, %v610_v8  ;;  %v1638_v13 = vpack.c.bf16 %v613_v12, %v612_v11  ;;  %v614_v14 = vld [vmem:[%s2359_s9 + $0x40] sm:$0xff]  ;;  %v886_v9 = vld [vmem:[%s2359_s9 + $0x1a8] sm:$0xff]  ;;  %v887_v11 = vld [vmem:[%s2359_s9 + $0x1b0] sm:$0xff] }
 0x136   :  { %v304_v18 = vmax.f32 %v223_v17, 0.0  ;;  %v617_v17 = vld [vmem:[%s2359_s9 + $0x58] sm:$0xff]  ;;  %v885_v8 = vld [vmem:[%s2359_s9 + $0x1a0] sm:$0xff] }
 0x137   :  { %v888_v12 = vld [vmem:[%s2359_s9 + $0x1b8] sm:$0xff] }
 0x138   :  { %1222 = vmatmul.mubr.f32.vlgmr.msra.gmra.mrb[6].mxu0 %v304_v18  ;;  %v1646_v18 = vpack.c.bf16 %v617_v17, %v616_v16  ;;  %v891_v16 = vld [vmem:[%s2359_s9 + $0x1d0] sm:$0xff]  ;;  %v892_v17 = vld [vmem:[%s2359_s9 + $0x1d8] sm:$0xff] }
 0x139   :  { %1565 = vmatpush3.bf16.msra.mxu0 %v1562_v3 }
 0x13a   :  { %1567 = vmatprep.subr.bf16.mxu0 %v1566_v19 }
 0x13d   :  { %1569 = vmatpush3.bf16.msra.mxu0 %v1566_v19  ;;  %v618_v19 = vld [vmem:[%s2359_s9 + $0x60] sm:$0xff] }
 0x13e   :  { %1571 = vmatprep.subr.bf16.mxu0 %v1570_v22  ;;  %v1650_v21 = vpack.c.bf16 %v619_v20, %v618_v19  ;;  %v893_v19 = vld [vmem:[%s2359_s9 + $0x1e0] sm:$0xff]  ;;  %v894_v20 = vld [vmem:[%s2359_s9 + $0x1e8] sm:$0xff] }
 0x141   :  { %1573 = vmatpush3.bf16.msra.mxu0 %v1570_v22  ;;  %v620_v22 = vld [vmem:[%s2359_s9 + $0x70] sm:$0xff] }
 0x142   :  { %1575 = vmatprep.subr.bf16.mxu0 %v1574_v25  ;;  %v1654_v24 = vpack.c.bf16 %v621_v23, %v620_v22  ;;  %v1005_v22 = vld [vmem:[%s2356_s6] ss:$0 sm:$0xff] }
 0x145   :  { %1577 = vmatpush3.bf16.msra.mxu0 %v1574_v25  ;;  %v788_v25 = vld [vmem:[%s2359_s9 + $0x100] sm:$0xff] }
 0x146   :  { %1579 = vmatprep.subr.bf16.mxu0 %v1578_v28  ;;  %v1658_v27 = vpack.c.bf16 %v789_v26, %v788_v25 }
 0x149   :  { %1581 = vmatpush3.bf16.msra.mxu0 %v1578_v28  ;;  %v516_v28 = vld [vmem:[#allocation7 + $0x50] sm:$0xff] }
 0x14a   :  { %v1582_v32 = vpack.c.bf16 %v517_v29, %v516_v28  ;;  %v895_v29 = vld [vmem:[%s2359_s9 + $0x1f0] sm:$0xff] }
 0x14c   :  { %1583 = vmatprep.subr.bf16.mxu0 %v1582_v32 }
 0x14d   :  { %1585 = vmatpush3.bf16.msra.mxu0 %v1582_v32  ;;  %v1006_v32 = vld [vmem:[%s2358_s8] ss:$0 sm:$0xff] }
 0x14e   :  { %v1188_v33 = vpop.f32.mrb[4].mxu0 }
 0x14f   :  { %v297_v34 = vadd.f32 %v1188_v33, %v144_v31  ;;  %v291_v35 = vpop.f32.mrb[5].mxu0  ;;  %v518_v33 = vld [vmem:[#allocation7 + $0x60] sm:$0xff] }
 0x150   :  { %v292_v37 = vadd.f32 %v291_v35, %v144_v31  ;;  %v791_v31 = vld [vmem:[%s2359_s9 + $0x118] sm:$0xff] }
 0x151   :  { %v305_v41 = vmax.f32 %v297_v34, 0.0  ;;  %v519_v34 = vld [vmem:[#allocation7 + $0x68] sm:$0xff]  ;;  %v1662_v36 = vpack.c.bf16 %v791_v31, %v790_v30 }
 0x152   :  { %v302_v40 = vmax.f32 %v292_v37, 0.0  ;;  %v1586_v35 = vpack.c.bf16 %v519_v34, %v518_v33  ;;  %v792_v37 = vld [vmem:[%s2359_s9 + $0x120] sm:$0xff]  ;;  %v896_v30 = vld [vmem:[%s2359_s9 + $0x1f8] sm:$0xff] }
 0x153   :  { %v1666_v39 = vpack.c.bf16 %v793_v38, %v792_v37  ;;  %v1718_v31 = vpack.c.bf16 %v896_v30, %v895_v29 }
 0x154   :  { %1256 = vmatprep.mubr.f32.mxu1 %v302_v40  ;;  %1587 = vmatprep.subr.bf16.mxu0 %v1586_v35  ;;  %v794_v40 = vld [vmem:[%s2359_s9 + $0x130] sm:$0xff] }
 0x155   :  { %1257 = vmatmul.mubr.f32.vlgmr.msra.gmra.mrb[0].mxu1 %v305_v41  ;;  %1589 = vmatpush3.bf16.msra.mxu0 %v1586_v35  ;;  %v795_v41 = vld [vmem:[%s2359_s9 + $0x138] sm:$0xff] }
 0x156   :  { %1597 = vmatpush3.bf16.msra.mxu1 %v1594_v0  ;;  %1326 = vmatprep.mubr.f32.mxu1 %v300_v43  ;;  %v606_v0 = vld [vmem:[%s2359_s9] sm:$0xff] }
 0x157   :  { %1599 = vmatprep.subr.bf16.mxu1 %v1598_v42  ;;  %v1626_v3 = vpack.c.bf16 %v607_v1, %v606_v0  ;;  %v796_v43 = vld [vmem:[%s2359_s9 + $0x140] sm:$0xff] }
 0x15a   :  { %1601 = vmatpush3.bf16.msra.mxu1 %v1598_v42  ;;  %v1670_v42 = vpack.c.bf16 %v795_v41, %v794_v40 }
 0x15b   :  { %1603 = vmatprep.subr.bf16.mxu1 %v1602_v46 }
 0x15e   :  { %1605 = vmatpush3.bf16.msra.mxu1 %v1602_v46  ;;  %v799_v46 = vld [vmem:[%s2359_s9 + $0x158] sm:$0xff] }
 0x15f   :  { %1607 = vmatprep.subr.bf16.mxu1 %v1606_v49  ;;  %v1678_v47 = vpack.c.bf16 %v799_v46, %v798_v45 }
 0x162   :  { %1609 = vmatpush3.bf16.msra.mxu1 %v1606_v49  ;;  %v801_v49 = vld [vmem:[%s2359_s9 + $0x168] sm:$0xff] }
 0x163   :  { %1611 = vmatprep.subr.bf16.mxu1 %v1610_v52  ;;  %v1682_v50 = vpack.c.bf16 %v801_v49, %v800_v48 }
 0x166   :  { %1613 = vmatpush3.bf16.msra.mxu1 %v1610_v52  ;;  %v803_v52 = vld [vmem:[%s2359_s9 + $0x178] sm:$0xff] }
 0x167   :  { %1615 = vmatprep.subr.bf16.mxu1 %v1614_v56  ;;  %v1686_v57 = vpack.c.bf16 %v803_v52, %v802_v51 }
 0x16a   :  { %1617 = vmatpush3.bf16.msra.mxu1 %v1614_v56  ;;  %v1590_v56 = vpack.c.bf16 %v521_v54, %v520_v53 }
 0x16b   :  { %1619 = vmatprep.subr.bf16.mxu1 %v1618_v60 }
 0x16c   :  { %1591 = vmatprep.subr.bf16.mxu0 %v1590_v56 }
 0x16d   :  { %1593 = vmatpush3.bf16.msra.mxu0 %v1590_v56 }
 0x16e   :  { %1621 = vmatpush3.bf16.msra.mxu1 %v1618_v60  ;;  %v882_v60 = vld [vmem:[%s2359_s9 + $0x188] sm:$0xff] }
 0x16f   :  { %1623 = vmatprep.subr.bf16.mxu1 %v1622_v63  ;;  %v1690_v61 = vpack.c.bf16 %v882_v60, %v881_v58 }
 0x172   :  { %1625 = vmatpush3.bf16.msra.mxu1 %v1622_v63 }
 0x173   :  { %1627 = vmatprep.subr.bf16.mxu1 %v1626_v3 }
 0x175   :  { %1327 = vmatmul.mubr.f32.vlgmr.msra.gmra.mrb[2].mxu1 %v303_v6 }
 0x176   :  { %1629 = vmatpush3.bf16.msra.mxu1 %v1626_v3  ;;  %1361 = vmatprep.mubr.f32.mxu1 %v2042_v55  ;;  %v615_v55 = vld [vmem:[%s2359_s9 + $0x48] sm:$0xff]  ;;  %v883_v3 = vld [vmem:[%s2359_s9 + $0x190] sm:$0xff] }
 0x177   :  { %1631 = vmatprep.subr.bf16.mxu1 %v1630_v7  ;;  %v1642_v15 = vpack.c.bf16 %v615_v55, %v614_v14  ;;  %v889_v14 = vld [vmem:[%s2359_s9 + $0x1c0] sm:$0xff]  ;;  %v890_v55 = vld [vmem:[%s2359_s9 + $0x1c8] sm:$0xff] }
 0x17a   :  { %1633 = vmatpush3.bf16.msra.mxu1 %v1630_v7  ;;  %v1694_v7 = vpack.c.bf16 %v884_v4, %v883_v3 }
 0x17b   :  { %1635 = vmatprep.subr.bf16.mxu1 %v1634_v10 }
 0x17e   :  { %1637 = vmatpush3.bf16.msra.mxu1 %v1634_v10  ;;  %v1698_v10 = vpack.c.bf16 %v886_v9, %v885_v8 }
 0x17f   :  { %1639 = vmatprep.subr.bf16.mxu1 %v1638_v13 }
 0x182   :  { %1641 = vmatpush3.bf16.msra.mxu1 %v1638_v13  ;;  %v1702_v13 = vpack.c.bf16 %v888_v12, %v887_v11 }
 0x183   :  { %1643 = vmatprep.subr.bf16.mxu1 %v1642_v15 }
 0x186   :  { %1645 = vmatpush3.bf16.msra.mxu1 %v1642_v15  ;;  %v1706_v15 = vpack.c.bf16 %v890_v55, %v889_v14 }
 0x187   :  { %1647 = vmatprep.subr.bf16.mxu1 %v1646_v18 }
 0x18a   :  { %1649 = vmatpush3.bf16.msra.mxu1 %v1646_v18  ;;  %v1710_v18 = vpack.c.bf16 %v892_v17, %v891_v16 }
 0x18b   :  { %1651 = vmatprep.subr.bf16.mxu1 %v1650_v21 }
 0x18e   :  { %1653 = vmatpush3.bf16.msra.mxu1 %v1650_v21  ;;  %v1714_v21 = vpack.c.bf16 %v894_v20, %v893_v19 }
 0x18f   :  { %1655 = vmatprep.subr.bf16.mxu1 %v1654_v24 }
 0x192   :  { %1657 = vmatpush3.bf16.msra.mxu1 %v1654_v24 }
 0x193   :  { %1659 = vmatprep.subr.bf16.mxu1 %v1658_v27 }
 0x195   :  { %1362 = vmatmul.mubr.f32.vlgmr.msra.gmra.mrb[2].mxu1 %v2052_v59  ;;  %v797_v59 = vld [vmem:[%s2359_s9 + $0x148] sm:$0xff] }
 0x196   :  { %1661 = vmatpush3.bf16.msra.mxu1 %v1658_v27  ;;  %v1674_v44 = vpack.c.bf16 %v797_v59, %v796_v43 }
 0x197   :  { %1663 = vmatprep.subr.bf16.mxu1 %v1662_v36 }
 0x19a   :  { %1665 = vmatpush3.bf16.msra.mxu1 %v1662_v36 }
 0x19b   :  { %1667 = vmatprep.subr.bf16.mxu1 %v1666_v39 }
 0x19e   :  { %1669 = vmatpush3.bf16.msra.mxu1 %v1666_v39  ;;  %v1007_v39 = vld [vmem:[#allocation2] ss:$0 sm:$0xff] }
 0x19f   :  { %1671 = vmatprep.subr.bf16.mxu1 %v1670_v42 }
 0x1a2   :  { %1673 = vmatpush3.bf16.msra.mxu1 %v1670_v42 }
 0x1a3   :  { %1675 = vmatprep.subr.bf16.mxu1 %v1674_v44 }
 0x1a6   :  { %1677 = vmatpush3.bf16.msra.mxu1 %v1674_v44 }
 0x1a7   :  { %1679 = vmatprep.subr.bf16.mxu1 %v1678_v47 }
 0x1aa   :  { %1681 = vmatpush3.bf16.msra.mxu1 %v1678_v47 }
 0x1ab   :  { %1683 = vmatprep.subr.bf16.mxu1 %v1682_v50 }
 0x1ae   :  { %1685 = vmatpush3.bf16.msra.mxu1 %v1682_v50 }
 0x1af   :  { %1687 = vmatprep.subr.bf16.mxu1 %v1686_v57 }
 0x1b2   :  { %1689 = vmatpush3.bf16.msra.mxu1 %v1686_v57 }
 0x1b3   :  { %1691 = vmatprep.subr.bf16.mxu1 %v1690_v61 }
 0x20b   :  { %v1223_v63 = vpop.f32.mrb[6].mxu0 }
 0x20c   :  { %v401_v0 = vadd.f32 %v1223_v63, %v1004_v62  ;;  %v395_v1 = vpop.f32.mrb[7].mxu0 }
 0x20d   :  { %v396_v2 = vadd.f32 %v1004_v62, %v395_v1 }
 0x20e   :  { %v405_v5 = vmax.f32 %v401_v0, 0.0 }
 0x20f   :  { %v404_v6 = vmax.f32 %v396_v2, 0.0 }
 0x211   :  { %1396 = vmatprep.mubr.f32.mxu1 %v404_v6 }
 0x212   :  { %1397 = vmatmul.mubr.f32.vlgmr.msra.gmra.mrb[2].mxu1 %v405_v5 }
 0x213   :  { %1693 = vmatpush3.bf16.msra.mxu1 %v1690_v61 }
 0x214   :  { %1695 = vmatprep.subr.bf16.mxu1 %v1694_v7 }
 0x217   :  { %1697 = vmatpush3.bf16.msra.mxu1 %v1694_v7 }
 0x218   :  { %1699 = vmatprep.subr.bf16.mxu1 %v1698_v10 }
 0x21b   :  { %1701 = vmatpush3.bf16.msra.mxu1 %v1698_v10 }
 0x21c   :  { %1703 = vmatprep.subr.bf16.mxu1 %v1702_v13 }
 0x21f   :  { %1705 = vmatpush3.bf16.msra.mxu1 %v1702_v13 }
 0x220   :  { %1707 = vmatprep.subr.bf16.mxu1 %v1706_v15 }
 0x223   :  { %1709 = vmatpush3.bf16.msra.mxu1 %v1706_v15 }
 0x224   :  { %1711 = vmatprep.subr.bf16.mxu1 %v1710_v18 }
 0x227   :  { %1713 = vmatpush3.bf16.msra.mxu1 %v1710_v18 }
 0x228   :  { %v1258_v23 = vpop.f32.mrb[0].mxu1  ;;  %1715 = vmatprep.subr.bf16.mxu1 %v1714_v21 }
 0x229   :  { %v501_v24 = vadd.f32 %v1258_v23, %v1005_v22  ;;  %v495_v25 = vpop.f32.mrb[1].mxu1 }
 0x22a   :  { %v496_v26 = vadd.f32 %v1005_v22, %v495_v25 }
 0x22b   :  { %1717 = vmatpush3.bf16.msra.mxu1 %v1714_v21  ;;  %v505_v28 = vmax.f32 %v501_v24, 0.0 }
 0x22c   :  { %v504_v27 = vmax.f32 %v496_v26, 0.0  ;;  %1719 = vmatprep.subr.bf16.mxu1 %v1718_v31 }
 0x22e   :  { %1291 = vmatprep.mubr.f32.mxu0 %v504_v27 }
 0x22f   :  { %1292 = vmatmul.mubr.f32.vlgmr.msra.gmra.mrb[8].mxu0 %v505_v28  ;;  %1721 = vmatpush3.bf16.msra.mxu1 %v1718_v31 }
 0x302   :  { %v1293_v33 = vpop.f32.mrb[8].mxu0 }
 0x303   :  { %v601_v34 = vadd.f32 %v1293_v33, %v1006_v32  ;;  %v595_v35 = vpop.f32.mrb[9].mxu0 }
 0x304   :  { %v596_v36 = vadd.f32 %v1006_v32, %v595_v35 }
 0x305   :  { %v605_v38 = vmax.f32 %v601_v34, 0.0 }
 0x306   :  { %v604_v37 = vmax.f32 %v596_v36, 0.0 }
 0x308   :  { %1431 = vmatprep.mubr.f32.mxu1 %v604_v37 }
 0x309   :  { %1432 = vmatmul.mubr.f32.vlgmr.msra.gmra.mrb[2].mxu1 %v605_v38 }
 0x3dc   :  { %v1433_v40 = vpop.f32.mrb[2].mxu1 }
 0x3dd   :  { %v982_v41 = vadd.f32 %v1433_v40, %v1007_v39  ;;  %v963_v42 = vpop.f32.mrb[3].mxu1 }
 0x3de   :  { %v981_v43 = vadd.f32 %v1007_v39, %v963_v42 }
 0x3df   :  { %v1009_v59 = vmul.f32 -1.442695, %v982_v41 }
 0x3e0   :  { %v1008_v44 = vmul.f32 -1.442695, %v981_v43 }
 0x3e1   :  { %1734 = vpow2.f32 %v1009_v59 }
 0x3e2   :  { %1736 = vpow2.f32 %v1008_v44 }
 0x3eb   :  { %v1735_v45 = vpop.eup %1734 }
 0x3ec   :  { %v1737_v46 = vpop.eup %1736  ;;  %v990_v47 = vadd.f32 1.0, %v1735_v45 }
 0x3ed   :  { %v989_v48 = vadd.f32 1.0, %v1737_v46 }
 0x3ee   :  { %1738 = vrcp.f32 %v990_v47 }
 0x3ef   :  { %1740 = vrcp.f32 %v989_v48 }
 0x3f8   :  { %v1739_v49 = vpop.eup %1738 }
 0x3f9   :  { %v1741_v50 = vpop.eup %1740  ;;  %997 = vst.msk [vmem:[%s2361_s11 + $0x8] sm:$0xff] %vm995_vm0, %v1739_v49 }
 0x3fa   :  { %996 = vst.msk [vmem:[%s2361_s11] sm:$0xff] %vm995_vm0, %v1741_v50 }
 0x3fb   :  { %1002 = vsyncpa [#allocation4], 1 }
 0x3fc   :  { %1003 = vsyncpa [#allocation6], 1 }

</bundles_post_ra>
